<compile_context>
chip_gen: v7x
topology: tpu7x:2x2x1
jax: 0.10.0
libtpu: 0.0.40
codegen_flags: <defaults>
</compile_context>

<pallas_src>
import functools

import jax
import jax.numpy as jnp
from jax.experimental import pallas as pl
from jax.experimental.pallas import tpu as pltpu


def _leaky_relu(x, alpha):
    return jnp.where(x > 0, x, alpha * x)


def _elu(x):
    # Clamp the exp argument so large positive x does not produce inf on the
    # discarded branch (forward value is identical).
    return jnp.where(x > 0, x, jnp.exp(jnp.minimum(x, 0.0)) - 1.0)


def _multistream_kernel(x_ref, w1_ref, a1_ref, w2_ref, a2_ref, o_ref, *,
                        alpha, batch, n_vertices):
    x = x_ref[...]  # (B*N, T) f32, entire problem resident in VMEM

    def gat_layer(z, w, a):
        # Batch-shared projections done once over all B*N vertices.
        h = jnp.dot(z, w, preferred_element_type=jnp.float32)   # (B*N, T)
        f = jnp.dot(h, a, preferred_element_type=jnp.float32)   # (B*N, 2)
        outs = []
        for b in range(batch):  # B is tiny & static -> Python-unrolled
            r0 = b * n_vertices
            hb = h[r0:r0 + n_vertices]        # (N, T)  sublane-aligned static slice
            fb = f[r0:r0 + n_vertices]        # (N, 2)
            f_src = fb[:, 0:1]                # (N, 1)
            f_dst = fb[:, 1:2]                # (N, 1)
            # f_dst.T is one tiny sublane->lane move (N=16); unavoidable since the
            # destination score must index the lane (column) axis.
            e = _leaky_relu(f_src + f_dst.T, alpha)              # (N, N)
            # Numerically stable softmax over neighbors.
            e = e - jnp.max(e, axis=-1, keepdims=True)
            p = jnp.exp(e)
            denom = jnp.sum(p, axis=-1, keepdims=True)
            att = p * pl.reciprocal(denom, approx=False)
            outs.append(_elu(jnp.dot(att, hb,
                                     preferred_element_type=jnp.float32)))
        return jnp.concatenate(outs, axis=0) if batch > 1 else outs[0]

    y = gat_layer(x, w1_ref[...], a1_ref[...])
    y = gat_layer(y, w2_ref[...], a2_ref[...])
    o_ref[...] = y.astype(o_ref.dtype)


def multistream_forward(x, params, *, alpha=0.2):
    """x: (B, N, T) float32. params: dict of layer weights."""
    B, N, T = x.shape
    # Pack the per-layer attention vectors into a single (T, 2) weight each.
    a1 = jnp.concatenate([params["a1_src"], params["a1_dst"]], axis=1)  # (T, 2)
    a2 = jnp.concatenate([params["a2_src"], params["a2_dst"]], axis=1)  # (T, 2)
    x2 = x.reshape(B * N, T)  # free XLA reshape; kernel sees one dense slab

    kernel = functools.partial(_multistream_kernel, alpha=alpha,
                               batch=B, n_vertices=N)

    def full(shape):
        return pl.BlockSpec(shape, lambda i: (0,) * len(shape))

    out = pl.pallas_call(
        kernel,
        out_shape=jax.ShapeDtypeStruct((B * N, T), x.dtype),
        grid_spec=pltpu.PrefetchScalarGridSpec(
            num_scalar_prefetch=0,
            grid=(1,),  # single step: whole problem fits trivially in VMEM
            in_specs=[
                full((B * N, T)),
                full((T, T)), full((T, 2)),
                full((T, T)), full((T, 2)),
            ],
            out_specs=full((B * N, T)),
        ),
        compiler_params=pltpu.CompilerParams(
            dimension_semantics=("arbitrary",)),
    )(x2, params["w1"], a1, params["w2"], a2)
    return out.reshape(B, N, T)


def init_params(key, time_steps):
    """Deterministic Xavier-uniform-style init (matches nn.Linear-ish scales)."""
    T = time_steps
    ks = jax.random.split(key, 6)
    lim_w = (6.0 / (T + T)) ** 0.5
    lim_a = (6.0 / (2 * T + 1)) ** 0.5
    u = lambda k, shape, lim: jax.random.uniform(
        k, shape, jnp.float32, minval=-lim, maxval=lim)
    return {
        "w1": u(ks[0], (T, T), lim_w),
        "a1_src": u(ks[1], (T, 1), lim_a),
        "a1_dst": u(ks[2], (T, 1), lim_a),
        "w2": u(ks[3], (T, T), lim_w),
        "a2_src": u(ks[4], (T, 1), lim_a),
        "a2_dst": u(ks[5], (T, 1), lim_a),
    }


def _reference(x, params, alpha=0.2):
    """Pure-JAX reference for correctness checking."""
    def layer(xb, w, a_s, a_d):
        h = xb @ w
        e = jax.nn.leaky_relu(h @ a_s + (h @ a_d).swapaxes(-1, -2),
                              negative_slope=alpha)
        att = jax.nn.softmax(e, axis=-1)
        return jax.nn.elu(att @ h)
    h = jax.vmap(lambda xb: layer(xb, params["w1"], params["a1_src"],
                                  params["a1_dst"]))(x)
    y = jax.vmap(lambda hb: layer(hb, params["w2"], params["a2_src"],
                                  params["a2_dst"]))(h)
    return y


if __name__ == "__main__":
    # Small shapes implied by the module: n_vertices=16, time_steps=4, batch=2.
    B, N, T = 2, 16, 4
    key = jax.random.PRNGKey(0)
    k_x, k_p = jax.random.split(key)
    x = jax.random.normal(k_x, (B, N, T), dtype=jnp.float32)
    params = init_params(k_p, T)

    out = multistream_forward(x, params)
    out = jax.block_until_ready(out)

    ref = _reference(x, params)
    assert out.shape == (B, N, T)
    assert jnp.allclose(out, ref, atol=1e-5, rtol=1e-5), "mismatch vs reference"
    print("KERNEL_OK")
</pallas_src>

<mosaic_0001>
module attributes {stable_mosaic.version = 11 : i64} {
  func.func @_multistream_kernel(%arg0: i32, %arg1: memref<32x4xf32, #tpu.memory_space<vmem>>, %arg2: memref<4x4xf32, #tpu.memory_space<vmem>>, %arg3: memref<4x2xf32, #tpu.memory_space<vmem>>, %arg4: memref<4x4xf32, #tpu.memory_space<vmem>>, %arg5: memref<4x2xf32, #tpu.memory_space<vmem>>, %arg6: memref<32x4xf32, #tpu.memory_space<vmem>>) attributes {dimension_semantics = [#tpu.dimension_semantics<arbitrary>], iteration_bounds = array<i64: 1>, scalar_prefetch = 0 : i64, scratch_operands = 0 : i64, tpu.core_type = #tpu.core_type<tc>, window_params = [{pipeline_mode = #tpu.pipeline_mode<synchronous>, transform_indices = @transform_0, window_bounds = array<i64: 32, 4>}, {pipeline_mode = #tpu.pipeline_mode<synchronous>, transform_indices = @transform_1, window_bounds = array<i64: 4, 4>}, {pipeline_mode = #tpu.pipeline_mode<synchronous>, transform_indices = @transform_2, window_bounds = array<i64: 4, 2>}, {pipeline_mode = #tpu.pipeline_mode<synchronous>, transform_indices = @transform_3, window_bounds = array<i64: 4, 4>}, {pipeline_mode = #tpu.pipeline_mode<synchronous>, transform_indices = @transform_4, window_bounds = array<i64: 4, 2>}, {pipeline_mode = #tpu.pipeline_mode<synchronous>, transform_indices = @transform_5, window_bounds = array<i64: 32, 4>}]} {
    %c0 = arith.constant 0 : index
    %c0_0 = arith.constant 0 : index
    %0 = vector.load %arg1[%c0, %c0_0] : memref<32x4xf32, #tpu.memory_space<vmem>>, vector<32x4xf32>
    %c0_1 = arith.constant 0 : index
    %c0_2 = arith.constant 0 : index
    %1 = vector.load %arg2[%c0_1, %c0_2] : memref<4x4xf32, #tpu.memory_space<vmem>>, vector<4x4xf32>
    %c0_3 = arith.constant 0 : index
    %c0_4 = arith.constant 0 : index
    %2 = vector.load %arg3[%c0_3, %c0_4] : memref<4x2xf32, #tpu.memory_space<vmem>>, vector<4x2xf32>
    %cst = arith.constant dense<0.000000e+00> : vector<32x4xf32>
    %3 = tpu.matmul %0, %1, %cst {dimension_numbers = #tpu.dot_dimension_numbers<[1], [0], [0], [1], [0, 0, 1, 1], [], []>} : vector<32x4xf32>, vector<4x4xf32>, vector<32x4xf32> -> vector<32x4xf32>
    %cst_5 = arith.constant dense<0.000000e+00> : vector<32x2xf32>
    %4 = tpu.matmul %3, %2, %cst_5 {dimension_numbers = #tpu.dot_dimension_numbers<[1], [0], [0], [1], [0, 0, 1, 1], [], []>} : vector<32x4xf32>, vector<4x2xf32>, vector<32x2xf32> -> vector<32x2xf32>
    %5 = vector.extract_strided_slice %3 {offsets = [0, 0], sizes = [16, 4], strides = [1, 1]} : vector<32x4xf32> to vector<16x4xf32>
    %6 = vector.extract_strided_slice %4 {offsets = [0, 0], sizes = [16, 2], strides = [1, 1]} : vector<32x2xf32> to vector<16x2xf32>
    %7 = vector.extract_strided_slice %6 {offsets = [0, 0], sizes = [16, 1], strides = [1, 1]} : vector<16x2xf32> to vector<16x1xf32>
    %8 = vector.extract_strided_slice %6 {offsets = [0, 1], sizes = [16, 1], strides = [1, 1]} : vector<16x2xf32> to vector<16x1xf32>
    %9 = tpu.transpose %8, [1, 0] : vector<16x1xf32> -> vector<1x16xf32>
    %10 = vector.broadcast %7 : vector<16x1xf32> to vector<16x16xf32>
    %11 = vector.broadcast %9 : vector<1x16xf32> to vector<16x16xf32>
    %12 = arith.addf %10, %11 : vector<16x16xf32>
    %cst_6 = arith.constant 0.000000e+00 : f32
    %13 = vector.broadcast %cst_6 : f32 to vector<16x16xf32>
    %14 = arith.cmpf ogt, %12, %13 : vector<16x16xf32>
    %cst_7 = arith.constant 2.000000e-01 : f32
    %15 = vector.broadcast %cst_7 : f32 to vector<16x16xf32>
    %16 = arith.mulf %15, %12 : vector<16x16xf32>
    %17 = arith.select %14, %12, %16 : vector<16x16xi1>, vector<16x16xf32>
    %cst_8 = arith.constant dense<0xFF800000> : vector<16xf32>
    %18 = vector.multi_reduction <maximumf>, %17, %cst_8 [1] : vector<16x16xf32> to vector<16xf32>
    %19 = vector.shape_cast %18 : vector<16xf32> to vector<16x1xf32>
    %20 = vector.broadcast %19 : vector<16x1xf32> to vector<16x16xf32>
    %21 = arith.subf %17, %20 : vector<16x16xf32>
    %22 = math.exp %21 : vector<16x16xf32>
    %cst_9 = arith.constant dense<0.000000e+00> : vector<16xf32>
    %23 = vector.multi_reduction <add>, %22, %cst_9 [1] : vector<16x16xf32> to vector<16xf32>
    %24 = vector.shape_cast %23 : vector<16xf32> to vector<16x1xf32>
    %25 = tpu.reciprocal %24 : vector<16x1xf32> -> vector<16x1xf32>
    %26 = vector.broadcast %25 : vector<16x1xf32> to vector<16x16xf32>
    %27 = arith.mulf %22, %26 : vector<16x16xf32>
    %cst_10 = arith.constant dense<0.000000e+00> : vector<16x4xf32>
    %28 = tpu.matmul %27, %5, %cst_10 {dimension_numbers = #tpu.dot_dimension_numbers<[1], [0], [0], [1], [0, 0, 1, 1], [], []>} : vector<16x16xf32>, vector<16x4xf32>, vector<16x4xf32> -> vector<16x4xf32>
    %cst_11 = arith.constant 0.000000e+00 : f32
    %29 = vector.broadcast %cst_11 : f32 to vector<16x4xf32>
    %30 = arith.cmpf ogt, %28, %29 : vector<16x4xf32>
    %cst_12 = arith.constant 0.000000e+00 : f32
    %31 = vector.broadcast %cst_12 : f32 to vector<16x4xf32>
    %32 = arith.minimumf %28, %31 : vector<16x4xf32>
    %33 = math.exp %32 : vector<16x4xf32>
    %cst_13 = arith.constant 1.000000e+00 : f32
    %34 = vector.broadcast %cst_13 : f32 to vector<16x4xf32>
    %35 = arith.subf %33, %34 : vector<16x4xf32>
    %36 = arith.select %30, %28, %35 : vector<16x4xi1>, vector<16x4xf32>
    %37 = vector.extract_strided_slice %3 {offsets = [16, 0], sizes = [16, 4], strides = [1, 1]} : vector<32x4xf32> to vector<16x4xf32>
    %38 = vector.extract_strided_slice %4 {offsets = [16, 0], sizes = [16, 2], strides = [1, 1]} : vector<32x2xf32> to vector<16x2xf32>
    %39 = vector.extract_strided_slice %38 {offsets = [0, 0], sizes = [16, 1], strides = [1, 1]} : vector<16x2xf32> to vector<16x1xf32>
    %40 = vector.extract_strided_slice %38 {offsets = [0, 1], sizes = [16, 1], strides = [1, 1]} : vector<16x2xf32> to vector<16x1xf32>
    %41 = tpu.transpose %40, [1, 0] : vector<16x1xf32> -> vector<1x16xf32>
    %42 = vector.broadcast %39 : vector<16x1xf32> to vector<16x16xf32>
    %43 = vector.broadcast %41 : vector<1x16xf32> to vector<16x16xf32>
    %44 = arith.addf %42, %43 : vector<16x16xf32>
    %cst_14 = arith.constant 0.000000e+00 : f32
    %45 = vector.broadcast %cst_14 : f32 to vector<16x16xf32>
    %46 = arith.cmpf ogt, %44, %45 : vector<16x16xf32>
    %cst_15 = arith.constant 2.000000e-01 : f32
    %47 = vector.broadcast %cst_15 : f32 to vector<16x16xf32>
    %48 = arith.mulf %47, %44 : vector<16x16xf32>
    %49 = arith.select %46, %44, %48 : vector<16x16xi1>, vector<16x16xf32>
    %cst_16 = arith.constant dense<0xFF800000> : vector<16xf32>
    %50 = vector.multi_reduction <maximumf>, %49, %cst_16 [1] : vector<16x16xf32> to vector<16xf32>
    %51 = vector.shape_cast %50 : vector<16xf32> to vector<16x1xf32>
    %52 = vector.broadcast %51 : vector<16x1xf32> to vector<16x16xf32>
    %53 = arith.subf %49, %52 : vector<16x16xf32>
    %54 = math.exp %53 : vector<16x16xf32>
    %cst_17 = arith.constant dense<0.000000e+00> : vector<16xf32>
    %55 = vector.multi_reduction <add>, %54, %cst_17 [1] : vector<16x16xf32> to vector<16xf32>
    %56 = vector.shape_cast %55 : vector<16xf32> to vector<16x1xf32>
    %57 = tpu.reciprocal %56 : vector<16x1xf32> -> vector<16x1xf32>
    %58 = vector.broadcast %57 : vector<16x1xf32> to vector<16x16xf32>
    %59 = arith.mulf %54, %58 : vector<16x16xf32>
    %cst_18 = arith.constant dense<0.000000e+00> : vector<16x4xf32>
    %60 = tpu.matmul %59, %37, %cst_18 {dimension_numbers = #tpu.dot_dimension_numbers<[1], [0], [0], [1], [0, 0, 1, 1], [], []>} : vector<16x16xf32>, vector<16x4xf32>, vector<16x4xf32> -> vector<16x4xf32>
    %cst_19 = arith.constant 0.000000e+00 : f32
    %61 = vector.broadcast %cst_19 : f32 to vector<16x4xf32>
    %62 = arith.cmpf ogt, %60, %61 : vector<16x4xf32>
    %cst_20 = arith.constant 0.000000e+00 : f32
    %63 = vector.broadcast %cst_20 : f32 to vector<16x4xf32>
    %64 = arith.minimumf %60, %63 : vector<16x4xf32>
    %65 = math.exp %64 : vector<16x4xf32>
    %cst_21 = arith.constant 1.000000e+00 : f32
    %66 = vector.broadcast %cst_21 : f32 to vector<16x4xf32>
    %67 = arith.subf %65, %66 : vector<16x4xf32>
    %68 = arith.select %62, %60, %67 : vector<16x4xi1>, vector<16x4xf32>
    %69 = tpu.concatenate %36, %68 in 0 : vector<16x4xf32>, vector<16x4xf32> -> vector<32x4xf32>
    %c0_22 = arith.constant 0 : index
    %c0_23 = arith.constant 0 : index
    %70 = vector.load %arg4[%c0_22, %c0_23] : memref<4x4xf32, #tpu.memory_space<vmem>>, vector<4x4xf32>
    %c0_24 = arith.constant 0 : index
    %c0_25 = arith.constant 0 : index
    %71 = vector.load %arg5[%c0_24, %c0_25] : memref<4x2xf32, #tpu.memory_space<vmem>>, vector<4x2xf32>
    %cst_26 = arith.constant dense<0.000000e+00> : vector<32x4xf32>
    %72 = tpu.matmul %69, %70, %cst_26 {dimension_numbers = #tpu.dot_dimension_numbers<[1], [0], [0], [1], [0, 0, 1, 1], [], []>} : vector<32x4xf32>, vector<4x4xf32>, vector<32x4xf32> -> vector<32x4xf32>
    %cst_27 = arith.constant dense<0.000000e+00> : vector<32x2xf32>
    %73 = tpu.matmul %72, %71, %cst_27 {dimension_numbers = #tpu.dot_dimension_numbers<[1], [0], [0], [1], [0, 0, 1, 1], [], []>} : vector<32x4xf32>, vector<4x2xf32>, vector<32x2xf32> -> vector<32x2xf32>
    %74 = vector.extract_strided_slice %72 {offsets = [0, 0], sizes = [16, 4], strides = [1, 1]} : vector<32x4xf32> to vector<16x4xf32>
    %75 = vector.extract_strided_slice %73 {offsets = [0, 0], sizes = [16, 2], strides = [1, 1]} : vector<32x2xf32> to vector<16x2xf32>
    %76 = vector.extract_strided_slice %75 {offsets = [0, 0], sizes = [16, 1], strides = [1, 1]} : vector<16x2xf32> to vector<16x1xf32>
    %77 = vector.extract_strided_slice %75 {offsets = [0, 1], sizes = [16, 1], strides = [1, 1]} : vector<16x2xf32> to vector<16x1xf32>
    %78 = tpu.transpose %77, [1, 0] : vector<16x1xf32> -> vector<1x16xf32>
    %79 = vector.broadcast %76 : vector<16x1xf32> to vector<16x16xf32>
    %80 = vector.broadcast %78 : vector<1x16xf32> to vector<16x16xf32>
    %81 = arith.addf %79, %80 : vector<16x16xf32>
    %cst_28 = arith.constant 0.000000e+00 : f32
    %82 = vector.broadcast %cst_28 : f32 to vector<16x16xf32>
    %83 = arith.cmpf ogt, %81, %82 : vector<16x16xf32>
    %cst_29 = arith.constant 2.000000e-01 : f32
    %84 = vector.broadcast %cst_29 : f32 to vector<16x16xf32>
    %85 = arith.mulf %84, %81 : vector<16x16xf32>
    %86 = arith.select %83, %81, %85 : vector<16x16xi1>, vector<16x16xf32>
    %cst_30 = arith.constant dense<0xFF800000> : vector<16xf32>
    %87 = vector.multi_reduction <maximumf>, %86, %cst_30 [1] : vector<16x16xf32> to vector<16xf32>
    %88 = vector.shape_cast %87 : vector<16xf32> to vector<16x1xf32>
    %89 = vector.broadcast %88 : vector<16x1xf32> to vector<16x16xf32>
    %90 = arith.subf %86, %89 : vector<16x16xf32>
    %91 = math.exp %90 : vector<16x16xf32>
    %cst_31 = arith.constant dense<0.000000e+00> : vector<16xf32>
    %92 = vector.multi_reduction <add>, %91, %cst_31 [1] : vector<16x16xf32> to vector<16xf32>
    %93 = vector.shape_cast %92 : vector<16xf32> to vector<16x1xf32>
    %94 = tpu.reciprocal %93 : vector<16x1xf32> -> vector<16x1xf32>
    %95 = vector.broadcast %94 : vector<16x1xf32> to vector<16x16xf32>
    %96 = arith.mulf %91, %95 : vector<16x16xf32>
    %cst_32 = arith.constant dense<0.000000e+00> : vector<16x4xf32>
    %97 = tpu.matmul %96, %74, %cst_32 {dimension_numbers = #tpu.dot_dimension_numbers<[1], [0], [0], [1], [0, 0, 1, 1], [], []>} : vector<16x16xf32>, vector<16x4xf32>, vector<16x4xf32> -> vector<16x4xf32>
    %cst_33 = arith.constant 0.000000e+00 : f32
    %98 = vector.broadcast %cst_33 : f32 to vector<16x4xf32>
    %99 = arith.cmpf ogt, %97, %98 : vector<16x4xf32>
    %cst_34 = arith.constant 0.000000e+00 : f32
    %100 = vector.broadcast %cst_34 : f32 to vector<16x4xf32>
    %101 = arith.minimumf %97, %100 : vector<16x4xf32>
    %102 = math.exp %101 : vector<16x4xf32>
    %cst_35 = arith.constant 1.000000e+00 : f32
    %103 = vector.broadcast %cst_35 : f32 to vector<16x4xf32>
    %104 = arith.subf %102, %103 : vector<16x4xf32>
    %105 = arith.select %99, %97, %104 : vector<16x4xi1>, vector<16x4xf32>
    %106 = vector.extract_strided_slice %72 {offsets = [16, 0], sizes = [16, 4], strides = [1, 1]} : vector<32x4xf32> to vector<16x4xf32>
    %107 = vector.extract_strided_slice %73 {offsets = [16, 0], sizes = [16, 2], strides = [1, 1]} : vector<32x2xf32> to vector<16x2xf32>
    %108 = vector.extract_strided_slice %107 {offsets = [0, 0], sizes = [16, 1], strides = [1, 1]} : vector<16x2xf32> to vector<16x1xf32>
    %109 = vector.extract_strided_slice %107 {offsets = [0, 1], sizes = [16, 1], strides = [1, 1]} : vector<16x2xf32> to vector<16x1xf32>
    %110 = tpu.transpose %109, [1, 0] : vector<16x1xf32> -> vector<1x16xf32>
    %111 = vector.broadcast %108 : vector<16x1xf32> to vector<16x16xf32>
    %112 = vector.broadcast %110 : vector<1x16xf32> to vector<16x16xf32>
    %113 = arith.addf %111, %112 : vector<16x16xf32>
    %cst_36 = arith.constant 0.000000e+00 : f32
    %114 = vector.broadcast %cst_36 : f32 to vector<16x16xf32>
    %115 = arith.cmpf ogt, %113, %114 : vector<16x16xf32>
    %cst_37 = arith.constant 2.000000e-01 : f32
    %116 = vector.broadcast %cst_37 : f32 to vector<16x16xf32>
    %117 = arith.mulf %116, %113 : vector<16x16xf32>
    %118 = arith.select %115, %113, %117 : vector<16x16xi1>, vector<16x16xf32>
    %cst_38 = arith.constant dense<0xFF800000> : vector<16xf32>
    %119 = vector.multi_reduction <maximumf>, %118, %cst_38 [1] : vector<16x16xf32> to vector<16xf32>
    %120 = vector.shape_cast %119 : vector<16xf32> to vector<16x1xf32>
    %121 = vector.broadcast %120 : vector<16x1xf32> to vector<16x16xf32>
    %122 = arith.subf %118, %121 : vector<16x16xf32>
    %123 = math.exp %122 : vector<16x16xf32>
    %cst_39 = arith.constant dense<0.000000e+00> : vector<16xf32>
    %124 = vector.multi_reduction <add>, %123, %cst_39 [1] : vector<16x16xf32> to vector<16xf32>
    %125 = vector.shape_cast %124 : vector<16xf32> to vector<16x1xf32>
    %126 = tpu.reciprocal %125 : vector<16x1xf32> -> vector<16x1xf32>
    %127 = vector.broadcast %126 : vector<16x1xf32> to vector<16x16xf32>
    %128 = arith.mulf %123, %127 : vector<16x16xf32>
    %cst_40 = arith.constant dense<0.000000e+00> : vector<16x4xf32>
    %129 = tpu.matmul %128, %106, %cst_40 {dimension_numbers = #tpu.dot_dimension_numbers<[1], [0], [0], [1], [0, 0, 1, 1], [], []>} : vector<16x16xf32>, vector<16x4xf32>, vector<16x4xf32> -> vector<16x4xf32>
    %cst_41 = arith.constant 0.000000e+00 : f32
    %130 = vector.broadcast %cst_41 : f32 to vector<16x4xf32>
    %131 = arith.cmpf ogt, %129, %130 : vector<16x4xf32>
    %cst_42 = arith.constant 0.000000e+00 : f32
    %132 = vector.broadcast %cst_42 : f32 to vector<16x4xf32>
    %133 = arith.minimumf %129, %132 : vector<16x4xf32>
    %134 = math.exp %133 : vector<16x4xf32>
    %cst_43 = arith.constant 1.000000e+00 : f32
    %135 = vector.broadcast %cst_43 : f32 to vector<16x4xf32>
    %136 = arith.subf %134, %135 : vector<16x4xf32>
    %137 = arith.select %131, %129, %136 : vector<16x4xi1>, vector<16x4xf32>
    %138 = tpu.concatenate %105, %137 in 0 : vector<16x4xf32>, vector<16x4xf32> -> vector<32x4xf32>
    %c0_44 = arith.constant 0 : index
    %c0_45 = arith.constant 0 : index
    %139 = vector.load %arg6[%c0_44, %c0_45] : memref<32x4xf32, #tpu.memory_space<vmem>>, vector<32x4xf32>
    tpu.vector_store %arg6[%c0_44, %c0_45], %138 {strides = array<i32>} : memref<32x4xf32, #tpu.memory_space<vmem>>, vector<32x4xf32>,
    return
  }
  func.func @transform_0(%arg0: i32) -> (i32, i32) {
    %c0_i32 = arith.constant 0 : i32
    %c0_i32_0 = arith.constant 0 : i32
    %c0_i32_1 = arith.constant 0 : i32
    return %c0_i32, %c0_i32_0 : i32, i32
  }
  func.func @transform_1(%arg0: i32) -> (i32, i32) {
    %c0_i32 = arith.constant 0 : i32
    %c0_i32_0 = arith.constant 0 : i32
    %c0_i32_1 = arith.constant 0 : i32
    return %c0_i32, %c0_i32_0 : i32, i32
  }
  func.func @transform_2(%arg0: i32) -> (i32, i32) {
    %c0_i32 = arith.constant 0 : i32
    %c0_i32_0 = arith.constant 0 : i32
    %c0_i32_1 = arith.constant 0 : i32
    return %c0_i32, %c0_i32_0 : i32, i32
  }
  func.func @transform_3(%arg0: i32) -> (i32, i32) {
    %c0_i32 = arith.constant 0 : i32
    %c0_i32_0 = arith.constant 0 : i32
    %c0_i32_1 = arith.constant 0 : i32
    return %c0_i32, %c0_i32_0 : i32, i32
  }
  func.func @transform_4(%arg0: i32) -> (i32, i32) {
    %c0_i32 = arith.constant 0 : i32
    %c0_i32_0 = arith.constant 0 : i32
    %c0_i32_1 = arith.constant 0 : i32
    return %c0_i32, %c0_i32_0 : i32, i32
  }
  func.func @transform_5(%arg0: i32) -> (i32, i32) {
    %c0_i32 = arith.constant 0 : i32
    %c0_i32_0 = arith.constant 0 : i32
    %c0_i32_1 = arith.constant 0 : i32
    return %c0_i32, %c0_i32_0 : i32, i32
  }
}

</mosaic_0001>

<bundles_post_ra>
// kernel: tpu_custom_call.1
= control target key start
LH: loop header
LB: loop body
LE: loop exit
PB: predicated region body
PF: predicated region fallthrough
CT: control target
= control target key end

     0   :  { %vm39_vm0 = vcmask 1043456   ;;  %vm26_vm1 = vcmask 31744   ;;  %v1340_v12 = vmov 0   ;;  %v276_v21 = vlaneseq  ;;  %s1474_s1 = inlined_call_operand.vmem [shape: f32[4,4], index: 1, kind: input, shape index: {}]   ;;  %s1475_s0 = inlined_call_operand.vmem [shape: f32[32,4], index: 0, kind: input, shape index: {}]   ;;  %s1476_s2 = inlined_call_operand.vmem [shape: f32[4,2], index: 2, kind: input, shape index: {}]   ;;  %s1477_s3 = inlined_call_operand.vmem [shape: f32[4,4], index: 3, kind: input, shape index: {}]   ;;  %s1478_s4 = inlined_call_operand.vmem [shape: f32[4,2], index: 4, kind: input, shape index: {}]   ;;  %s1479_s5 = inlined_call_operand.vmem [shape: f32[32,4], index: 5, kind: output, shape index: {}]  }
   0x1   :  { %v24_v0 = vld [vmem:[%s1474_s1] sm:$0xf]  ;;  %v21_v2 = vld [vmem:[%s1475_s0 + $0x8] sm:$0xff]  ;;  %v22_v3 = vld [vmem:[%s1475_s0 + $0x10] sm:$0xff]  ;;  %1290 = vset.pattern.permute.xlu0 %v1340_v12  ;;  %1291 = vset.pattern.permute.xlu1 %v1340_v12  ;;  %vm288_vm2 = vcmask 130048  }
   0x2   :  { %v20_v1 = vld [vmem:[%s1475_s0] sm:$0xff]  ;;  %1211 = vmatprep.subr.msk.mxu0 %vm39_vm0, %v24_v0  ;;  %v23_v4 = vld [vmem:[%s1475_s0 + $0x18] sm:$0xff]  ;;  %s1341_s0 = smov 127   ;;  %v277_v23 = vshrl.u32 %v276_v21, 7 }
   0x3   :  { %1213 = vmatprep.mubr.msk.f32.mxu0 %vm26_vm1, %v20_v1  ;;  %1212 = vmatpush3.msk.msra.mxu0 %vm39_vm0, %v24_v0  ;;  %v25_v5 = vld [vmem:[%s1476_s2] sm:$0xf] }
   0x4   :  { %1214 = vmatmul.mubr.msk.f32.vlgmr.msra.gmra.mrb[0].mxu0 %vm26_vm1, %v21_v2  ;;  %1219 = vmatprep.subr.msk.mxu1 %vm39_vm0, %v25_v5  ;;  %v1406_v26 = vsub.s32 0, %v277_v23 }
   0x5   :  { %1216 = vmatprep.mubr.msk.f32.mxu0 %vm26_vm1, %v22_v3  ;;  %1220 = vmatpush3.msk.msra.mxu1 %vm39_vm0, %v25_v5 }
   0x8   :  { %1217 = vmatmul.mubr.msk.f32.gmra.mrb[2].mxu0 %vm26_vm1, %v23_v4 }
  0xd7   :  { %v1215_v6 = vpop.f32.mrb[0].mxu0 }
  0xd8   :  { %v109_v7 = vpop.f32.mrb[1].mxu0 }
  0xd9   :  { %v1271_v8 = vpack.c.bf16 %v1215_v6, %v109_v7  ;;  %1221 = vmatprep.mubr.msk.f32.mxu1 %vm26_vm1, %v109_v7 }
  0xda   :  { %1222 = vmatmul.mubr.msk.f32.vlgmr.msra.gmra.mrb[0].mxu1 %vm26_vm1, %v1215_v6 }
  0xdb   :  { %v1218_v9 = vpop.f32.mrb[2].mxu0  ;;  %1272 = vmatprep.subr.bf16.mxu0 %v1271_v8 }
  0xdc   :  { %v119_v10 = vpop.f32.mrb[3].mxu0  ;;  %1274 = vmatpush3.bf16.msra.mxu0 %v1271_v8 }
  0xdd   :  { %v1275_v11 = vpack.c.bf16 %v1218_v9, %v119_v10  ;;  %1224 = vmatprep.mubr.msk.f32.mxu1 %vm26_vm1, %v119_v10 }
  0xde   :  { %1225 = vmatmul.mubr.msk.f32.gmra.mrb[2].mxu1 %vm26_vm1, %v1218_v9 }
  0xdf   :  { %1276 = vmatprep.subr.bf16.mxu1 %v1275_v11 }
  0xe0   :  { %1278 = vmatpush3.bf16.msra.mxu1 %v1275_v11 }
 0x1ad   :  { %v1223_v13 = vpop.f32.mrb[0].mxu1 }
 0x1ae   :  { %v209_v14 = vpop.f32.mrb[1].mxu1 }
 0x1af   :  { %230 = vrot.lane.b32.xlu0 %v209_v14, %s1341_s0 }
 0x1b1   :  { %v1226_v15 = vpop.f32.mrb[2].mxu1 }
 0x1b2   :  { %v219_v16 = vpop.f32.mrb[3].mxu1 }
 0x1b3   :  { %232 = vrot.lane.b32.xlu0 %v1223_v13, %s1341_s0  ;;  %406 = vrot.lane.b32.xlu1 %v219_v16, %s1341_s0 }
 0x1b7   :  { %269 = vperm.xlu0 %1290, %v209_v14   ;;  %408 = vrot.lane.b32.xlu1 %v1226_v15, %s1341_s0 }
 0x1bb   :  { %449 = vperm.xlu0 %1290, %v1226_v15   ;;  %273 = vperm.xlu1 %1291, %v1223_v13  }
 0x1bf   :  { %445 = vperm.xlu1 %1291, %v219_v16   ;;  %v579_v16 = vld [vmem:[%s1477_s3] sm:$0xf] }
 0x1c0   :  { %1241 = vmatprep.subr.msk.mxu0 %vm39_vm0, %v579_v16 }
 0x221   :  { %v231_v17 = vpop.permute.xlu0 %230 }
 0x222   :  { %236 = vxpose.xlu1.b32.start [1/2] (short) (narrow) %v231_v17, 8  ;;  %v580_v17 = vld [vmem:[%s1478_s4] sm:$0xf] }
 0x223   :  { %1249 = vmatprep.subr.msk.mxu1 %vm39_vm0, %v580_v17 }
 0x225   :  { %v233_v18 = vpop.permute.xlu0 %232  ;;  %v407_v19 = vpop.permute.xlu1 %406 }
 0x226   :  { %237 = vxpose.xlu1.b32.end [2/2] (short) (narrow) %v233_v18, 8  ;;  %412 = vxpose.xlu0.b32.start [1/2] (short) (narrow) %v407_v19, 8 }
 0x229   :  { %v409_v20 = vpop.permute.xlu1 %408 }
 0x22a   :  { %413 = vxpose.xlu0.b32.end [2/2] (short) (narrow) %v409_v20, 8 }
 0x236   :  { %v270_v24 = vpop.permute.xlu0 %269 }
 0x23a   :  { %v274_v22 = vpop.permute.xlu1 %273  ;;  %v450_v27 = vpop.permute.xlu0 %449 }
 0x23e   :  { %v446_v25 = vpop.permute.xlu1 %445 }
 0x2a2   :  { %v252_v28 = vpop.trf.xlu1 }
 0x2a3   :  { %v279_v29 = vrot.slane %v252_v28, %v1406_v26 }
 0x2a5   :  { %v280_v30 = vadd.f32 %v279_v29, %v270_v24  ;;  %v281_v31 = vadd.f32 %v279_v29, %v274_v22 }
 0x2a6   :  { %v428_v32 = vpop.trf.xlu0 }
 0x2a7   :  { %v455_v33 = vrot.slane %v428_v32, %v1406_v26  ;;  %vm283_vm3 = vcmp.gt.f32.partialorder %v281_v31, 0.0  ;;  %v285_v34 = vmul.f32 0.2, %v281_v31  ;;  %vm282_vm4 = vcmp.gt.f32.partialorder %v280_v30, 0.0 }
 0x2a8   :  { %v284_v35 = vmul.f32 0.2, %v280_v30 }
 0x2a9   :  { %v456_v36 = vadd.f32 %v455_v33, %v446_v25  ;;  %v457_v37 = vadd.f32 %v455_v33, %v450_v27  ;;  %v287_v38 = vsel %vm283_vm3, %v281_v31, %v285_v34 }
 0x2aa   :  { %v292_v39 = vsel %vm288_vm2, %v287_v38, -inf  ;;  %v286_v40 = vsel %vm282_vm4, %v280_v30, %v284_v35 }
 0x2ab   :  { %293 = vmax.xlane.f32.xlu1 %v292_v39  ;;  %v289_v41 = vsel %vm288_vm2, %v286_v40, -inf  ;;  %vm459_vm5 = vcmp.gt.f32.partialorder %v457_v37, 0.0  ;;  %v461_v42 = vmul.f32 0.2, %v457_v37  ;;  %vm458_vm6 = vcmp.gt.f32.partialorder %v456_v36, 0.0 }
 0x2ac   :  { %290 = vmax.xlane.f32.xlu0 %v289_v41  ;;  %v460_v43 = vmul.f32 0.2, %v456_v36 }
 0x2ad   :  { %v463_v44 = vsel %vm459_vm5, %v457_v37, %v461_v42 }
 0x2ae   :  { %v467_v45 = vsel %vm288_vm2, %v463_v44, -inf  ;;  %v462_v46 = vsel %vm458_vm6, %v456_v36, %v460_v43 }
 0x2af   :  { %468 = vmax.xlane.f32.xlu1 %v467_v45  ;;  %v464_v47 = vsel %vm288_vm2, %v462_v46, -inf }
 0x2b0   :  { %465 = vmax.xlane.f32.xlu0 %v464_v47 }
 0x338   :  { %v294_v48 = vpop.xlane.xlu1 %293 }
 0x339   :  { %v296_v49 = vsub.f32 %v287_v38, %v294_v48  ;;  %v291_v50 = vpop.xlane.xlu0 %290 }
 0x33a   :  { %v295_v51 = vsub.f32 %v286_v40, %v291_v50 }
 0x33b   :  { %v299_v52 = vmul.f32 1.442695, %v296_v49 }
 0x33c   :  { %v297_v53 = vmul.f32 1.442695, %v295_v51  ;;  %v469_v54 = vpop.xlane.xlu1 %468 }
 0x33d   :  { %1292 = vpow2.f32 %v299_v52  ;;  %v471_v55 = vsub.f32 %v463_v44, %v469_v54  ;;  %v466_v56 = vpop.xlane.xlu0 %465 }
 0x33e   :  { %1294 = vpow2.f32 %v297_v53  ;;  %v470_v57 = vsub.f32 %v462_v46, %v466_v56 }
 0x33f   :  { %v474_v58 = vmul.f32 1.442695, %v471_v55 }
 0x340   :  { %v472_v59 = vmul.f32 1.442695, %v470_v57 }
 0x341   :  { %1296 = vpow2.f32 %v474_v58 }
 0x342   :  { %1298 = vpow2.f32 %v472_v59 }
 0x347   :  { %v1293_v60 = vpop.eup %1292 }
 0x348   :  { %v1295_v61 = vpop.eup %1294  ;;  %v304_v62 = vsel %vm288_vm2, %v1293_v60, 0.0 }
 0x349   :  { %305 = vadd.xlane.f32.xlu1 %v304_v62  ;;  %v301_v63 = vsel %vm288_vm2, %v1295_v61, 0.0 }
 0x34a   :  { %302 = vadd.xlane.f32.xlu0 %v301_v63 }
 0x34b   :  { %v1297_v0 = vpop.eup %1296 }
 0x34c   :  { %v1299_v1 = vpop.eup %1298  ;;  %v479_v2 = vsel %vm288_vm2, %v1297_v0, 0.0 }
 0x34d   :  { %480 = vadd.xlane.f32.xlu1 %v479_v2  ;;  %v476_v3 = vsel %vm288_vm2, %v1299_v1, 0.0 }
 0x34e   :  { %477 = vadd.xlane.f32.xlu0 %v476_v3 }
 0x3d6   :  { %v306_v4 = vpop.xlane.xlu1 %305 }
 0x3d7   :  { %1300 = vrcp.f32 %v306_v4  ;;  %v303_v5 = vpop.xlane.xlu0 %302 }
 0x3d8   :  { %1302 = vrcp.f32 %v303_v5 }
 0x3da   :  { %v481_v6 = vpop.xlane.xlu1 %480 }
 0x3db   :  { %1304 = vrcp.f32 %v481_v6  ;;  %v478_v7 = vpop.xlane.xlu0 %477 }
 0x3dc   :  { %1306 = vrcp.f32 %v478_v7 }
 0x3e1   :  { %v1301_v8 = vpop.eup %1300 }
 0x3e2   :  { %v1303_v9 = vpop.eup %1302  ;;  %v310_v10 = vmul.f32 %v1301_v8, %v1293_v60 }
 0x3e3   :  { %v309_v11 = vmul.f32 %v1303_v9, %v1295_v61 }
 0x3e5   :  { %v1305_v12 = vpop.eup %1304  ;;  %1231 = vmatprep.mubr.msk.f32.mxu0 %vm288_vm2, %v309_v11 }
 0x3e6   :  { %v1307_v13 = vpop.eup %1306  ;;  %v485_v14 = vmul.f32 %v1305_v12, %v1297_v0  ;;  %1232 = vmatmul.mubr.msk.f32.vlgmr.msra.gmra.mrb[4].mxu0 %vm288_vm2, %v310_v10 }
 0x3e7   :  { %v484_v15 = vmul.f32 %v1307_v13, %v1299_v1  ;;  %1242 = vmatpush3.msk.msra.mxu0 %vm39_vm0, %v579_v16 }
 0x3e9   :  { %1238 = vmatprep.mubr.msk.f32.mxu1 %vm288_vm2, %v484_v15 }
 0x3ea   :  { %1239 = vmatmul.mubr.msk.f32.vlgmr.msra.gmra.mrb[4].mxu1 %vm288_vm2, %v485_v14 }
 0x3eb   :  { %1250 = vmatpush3.msk.msra.mxu1 %vm39_vm0, %v580_v17 }
 0x4b9   :  { %v1233_v18 = vpop.f32.mrb[4].mxu0 }
 0x4ba   :  { %v395_v19 = vmin.f32 %v1233_v18, 0.0  ;;  %v383_v20 = vpop.f32.mrb[5].mxu0  ;;  %vm393_vm8 = vcmp.gt.f32.partialorder %v1233_v18, 0.0 }
 0x4bb   :  { %v394_v21 = vmin.f32 %v383_v20, 0.0  ;;  %vm392_vm7 = vcmp.gt.f32.partialorder %v383_v20, 0.0 }
 0x4bc   :  { %v398_v22 = vmul.f32 1.442695, %v395_v19 }
 0x4bd   :  { %v396_v23 = vmul.f32 1.442695, %v394_v21  ;;  %v1240_v24 = vpop.f32.mrb[4].mxu1 }
 0x4be   :  { %1308 = vpow2.f32 %v398_v22  ;;  %v570_v25 = vmin.f32 %v1240_v24, 0.0  ;;  %v558_v27 = vpop.f32.mrb[5].mxu1  ;;  %vm568_vm10 = vcmp.gt.f32.partialorder %v1240_v24, 0.0 }
 0x4bf   :  { %1310 = vpow2.f32 %v396_v23  ;;  %v569_v28 = vmin.f32 %v558_v27, 0.0  ;;  %vm567_vm9 = vcmp.gt.f32.partialorder %v558_v27, 0.0 }
 0x4c0   :  { %v573_v29 = vmul.f32 1.442695, %v570_v25 }
 0x4c1   :  { %v571_v30 = vmul.f32 1.442695, %v569_v28 }
 0x4c2   :  { %1312 = vpow2.f32 %v573_v29 }
 0x4c3   :  { %1314 = vpow2.f32 %v571_v30 }
 0x4c8   :  { %v1309_v31 = vpop.eup %1308 }
 0x4c9   :  { %v1311_v32 = vpop.eup %1310  ;;  %v1152_v33 = vadd.f32 -1.0, %v1309_v31 }
 0x4ca   :  { %v1151_v34 = vadd.f32 -1.0, %v1311_v32 }
 0x4cb   :  { %v403_v38 = vsel %vm393_vm8, %v1233_v18, %v1152_v33 }
 0x4cc   :  { %v1313_v35 = vpop.eup %1312  ;;  %v402_v36 = vsel %vm392_vm7, %v383_v20, %v1151_v34 }
 0x4cd   :  { %v1315_v37 = vpop.eup %1314  ;;  %v1156_v39 = vadd.f32 -1.0, %v1313_v35  ;;  %1243 = vmatprep.mubr.msk.f32.mxu0 %vm26_vm1, %v402_v36 }
 0x4ce   :  { %v1155_v40 = vadd.f32 -1.0, %v1315_v37  ;;  %1244 = vmatmul.mubr.msk.f32.vlgmr.msra.gmra.mrb[6].mxu0 %vm26_vm1, %v403_v38 }
 0x4cf   :  { %v578_v42 = vsel %vm568_vm10, %v1240_v24, %v1156_v39 }
 0x4d0   :  { %v577_v41 = vsel %vm567_vm9, %v558_v27, %v1155_v40 }
 0x4d1   :  { %1246 = vmatprep.mubr.msk.f32.mxu0 %vm26_vm1, %v577_v41 }
 0x4d2   :  { %1247 = vmatmul.mubr.msk.f32.gmra.mrb[8].mxu0 %vm26_vm1, %v578_v42 }
 0x5a1   :  { %v1245_v43 = vpop.f32.mrb[6].mxu0 }
 0x5a2   :  { %v662_v44 = vpop.f32.mrb[7].mxu0 }
 0x5a3   :  { %v1279_v45 = vpack.c.bf16 %v1245_v43, %v662_v44  ;;  %1251 = vmatprep.mubr.msk.f32.mxu1 %vm26_vm1, %v662_v44 }
 0x5a4   :  { %1252 = vmatmul.mubr.msk.f32.vlgmr.msra.gmra.mrb[6].mxu1 %vm26_vm1, %v1245_v43 }
 0x5a5   :  { %v1248_v46 = vpop.f32.mrb[8].mxu0  ;;  %1280 = vmatprep.subr.bf16.mxu0 %v1279_v45 }
 0x5a6   :  { %v672_v47 = vpop.f32.mrb[9].mxu0  ;;  %1282 = vmatpush3.bf16.msra.mxu0 %v1279_v45 }
 0x5a7   :  { %v1283_v48 = vpack.c.bf16 %v1248_v46, %v672_v47  ;;  %1254 = vmatprep.mubr.msk.f32.mxu1 %vm26_vm1, %v672_v47 }
 0x5a8   :  { %1255 = vmatmul.mubr.msk.f32.gmra.mrb[8].mxu1 %vm26_vm1, %v1248_v46 }
 0x5a9   :  { %1284 = vmatprep.subr.bf16.mxu1 %v1283_v48 }
 0x5aa   :  { %1286 = vmatpush3.bf16.msra.mxu1 %v1283_v48 }
 0x677   :  { %v1253_v49 = vpop.f32.mrb[6].mxu1 }
 0x678   :  { %v762_v50 = vpop.f32.mrb[7].mxu1 }
 0x679   :  { %783 = vrot.lane.b32.xlu0 %v762_v50, %s1341_s0 }
 0x67b   :  { %v1256_v51 = vpop.f32.mrb[8].mxu1 }
 0x67c   :  { %v772_v52 = vpop.f32.mrb[9].mxu1 }
 0x67d   :  { %960 = vrot.lane.b32.xlu0 %v1256_v51, %s1341_s0  ;;  %958 = vrot.lane.b32.xlu1 %v772_v52, %s1341_s0 }
 0x681   :  { %1001 = vperm.xlu0 %1290, %v1256_v51   ;;  %785 = vrot.lane.b32.xlu1 %v1253_v49, %s1341_s0 }
 0x685   :  { %997 = vperm.xlu0 %1290, %v772_v52   ;;  %822 = vperm.xlu1 %1291, %v762_v50  }
 0x689   :  { %826 = vperm.xlu1 %1291, %v1253_v49  }
 0x6eb   :  { %v784_v53 = vpop.permute.xlu0 %783 }
 0x6ec   :  { %789 = vxpose.xlu1.b32.start [1/2] (short) (narrow) %v784_v53, 8 }
 0x6ef   :  { %v959_v54 = vpop.permute.xlu1 %958  ;;  %v961_v55 = vpop.permute.xlu0 %960 }
 0x6f0   :  { %964 = vxpose.xlu0.b32.start [1/2] (short) (narrow) %v959_v54, 8 }
 0x6f3   :  { %v786_v56 = vpop.permute.xlu1 %785 }
 0x6f4   :  { %965 = vxpose.xlu0.b32.end [2/2] (short) (narrow) %v961_v55, 8  ;;  %790 = vxpose.xlu1.b32.end [2/2] (short) (narrow) %v786_v56, 8 }
 0x700   :  { %v1002_v57 = vpop.permute.xlu0 %1001 }
 0x704   :  { %v823_v58 = vpop.permute.xlu1 %822  ;;  %v998_v59 = vpop.permute.xlu0 %997 }
 0x708   :  { %v827_v60 = vpop.permute.xlu1 %826 }
 0x770   :  { %v980_v61 = vpop.trf.xlu0  ;;  %v805_v62 = vpop.trf.xlu1 }
 0x771   :  { %v1007_v63 = vrot.slane %v980_v61, %v1406_v26  ;;  %v832_v0 = vrot.slane %v805_v62, %v1406_v26 }
 0x773   :  { %v1008_v1 = vadd.f32 %v1007_v63, %v998_v59  ;;  %v1009_v2 = vadd.f32 %v1007_v63, %v1002_v57  ;;  %v833_v3 = vadd.f32 %v832_v0, %v823_v58  ;;  %v834_v4 = vadd.f32 %v832_v0, %v827_v60 }
 0x775   :  { %vm1010_vm11 = vcmp.gt.f32.partialorder %v1008_v1, 0.0  ;;  %v1012_v5 = vmul.f32 0.2, %v1008_v1  ;;  %vm835_vm12 = vcmp.gt.f32.partialorder %v833_v3, 0.0  ;;  %v837_v6 = vmul.f32 0.2, %v833_v3 }
 0x776   :  { %vm1011_vm13 = vcmp.gt.f32.partialorder %v1009_v2, 0.0  ;;  %v1013_v7 = vmul.f32 0.2, %v1009_v2  ;;  %vm836_vm14 = vcmp.gt.f32.partialorder %v834_v4, 0.0  ;;  %v838_v8 = vmul.f32 0.2, %v834_v4 }
 0x777   :  { %v1014_v9 = vsel %vm1010_vm11, %v1008_v1, %v1012_v5  ;;  %v839_v10 = vsel %vm835_vm12, %v833_v3, %v837_v6 }
 0x778   :  { %v1016_v11 = vsel %vm288_vm2, %v1014_v9, -inf  ;;  %v841_v12 = vsel %vm288_vm2, %v839_v10, -inf  ;;  %v1015_v26 = vsel %vm1011_vm13, %v1009_v2, %v1013_v7  ;;  %v840_v13 = vsel %vm836_vm14, %v834_v4, %v838_v8 }
 0x779   :  { %1017 = vmax.xlane.f32.xlu1 %v1016_v11  ;;  %842 = vmax.xlane.f32.xlu0 %v841_v12  ;;  %v1019_v14 = vsel %vm288_vm2, %v1015_v26, -inf  ;;  %v844_v15 = vsel %vm288_vm2, %v840_v13, -inf }
 0x77d   :  { %1020 = vmax.xlane.f32.xlu1 %v1019_v14  ;;  %845 = vmax.xlane.f32.xlu0 %v844_v15 }
 0x806   :  { %v843_v16 = vpop.xlane.xlu0 %842  ;;  %v1018_v17 = vpop.xlane.xlu1 %1017 }
 0x807   :  { %v847_v18 = vsub.f32 %v839_v10, %v843_v16  ;;  %v1022_v19 = vsub.f32 %v1014_v9, %v1018_v17 }
 0x809   :  { %v849_v20 = vmul.f32 1.442695, %v847_v18  ;;  %v1024_v21 = vmul.f32 1.442695, %v1022_v19 }
 0x80a   :  { %v846_v22 = vpop.xlane.xlu0 %845  ;;  %v1021_v23 = vpop.xlane.xlu1 %1020 }
 0x80b   :  { %1316 = vpow2.f32 %v849_v20  ;;  %v848_v24 = vsub.f32 %v840_v13, %v846_v22  ;;  %v1023_v25 = vsub.f32 %v1015_v26, %v1021_v23 }
 0x80c   :  { %1318 = vpow2.f32 %v1024_v21 }
 0x80d   :  { %v851_v27 = vmul.f32 1.442695, %v848_v24  ;;  %v1026_v28 = vmul.f32 1.442695, %v1023_v25 }
 0x80f   :  { %1320 = vpow2.f32 %v851_v27 }
 0x810   :  { %1322 = vpow2.f32 %v1026_v28 }
 0x815   :  { %v1317_v29 = vpop.eup %1316 }
 0x816   :  { %v1319_v30 = vpop.eup %1318  ;;  %v853_v31 = vsel %vm288_vm2, %v1317_v29, 0.0 }
 0x817   :  { %854 = vadd.xlane.f32.xlu0 %v853_v31  ;;  %v1028_v32 = vsel %vm288_vm2, %v1319_v30, 0.0 }
 0x818   :  { %1029 = vadd.xlane.f32.xlu1 %v1028_v32 }
 0x819   :  { %v1321_v33 = vpop.eup %1320 }
 0x81a   :  { %v1323_v34 = vpop.eup %1322  ;;  %v856_v35 = vsel %vm288_vm2, %v1321_v33, 0.0 }
 0x81b   :  { %857 = vadd.xlane.f32.xlu0 %v856_v35  ;;  %v1031_v36 = vsel %vm288_vm2, %v1323_v34, 0.0 }
 0x81c   :  { %1032 = vadd.xlane.f32.xlu1 %v1031_v36 }
 0x8a4   :  { %v855_v37 = vpop.xlane.xlu0 %854 }
 0x8a5   :  { %1324 = vrcp.f32 %v855_v37  ;;  %v1030_v38 = vpop.xlane.xlu1 %1029 }
 0x8a6   :  { %1326 = vrcp.f32 %v1030_v38 }
 0x8a8   :  { %v858_v39 = vpop.xlane.xlu0 %857 }
 0x8a9   :  { %1328 = vrcp.f32 %v858_v39  ;;  %v1033_v40 = vpop.xlane.xlu1 %1032 }
 0x8aa   :  { %1330 = vrcp.f32 %v1033_v40 }
 0x8af   :  { %v1325_v41 = vpop.eup %1324 }
 0x8b0   :  { %v1327_v42 = vpop.eup %1326  ;;  %v861_v43 = vmul.f32 %v1325_v41, %v1317_v29 }
 0x8b1   :  { %v1036_v44 = vmul.f32 %v1327_v42, %v1319_v30 }
 0x8b2   :  { %1261 = vmatprep.mubr.msk.f32.mxu0 %vm288_vm2, %v861_v43 }
 0x8b3   :  { %v1329_v45 = vpop.eup %1328  ;;  %1268 = vmatprep.mubr.msk.f32.mxu1 %vm288_vm2, %v1036_v44 }
 0x8b4   :  { %v1331_v46 = vpop.eup %1330  ;;  %v862_v47 = vmul.f32 %v1329_v45, %v1321_v33 }
 0x8b5   :  { %v1037_v48 = vmul.f32 %v1331_v46, %v1323_v34 }
 0x8b6   :  { %1262 = vmatmul.mubr.msk.f32.vlgmr.msra.gmra.mrb[10].mxu0 %vm288_vm2, %v862_v47 }
 0x8b7   :  { %1269 = vmatmul.mubr.msk.f32.vlgmr.msra.gmra.mrb[10].mxu1 %vm288_vm2, %v1037_v48 }
 0x989   :  { %v1263_v49 = vpop.f32.mrb[10].mxu0 }
 0x98a   :  { %v947_v50 = vmin.f32 %v1263_v49, 0.0  ;;  %v1270_v51 = vpop.f32.mrb[10].mxu1  ;;  %v935_v52 = vpop.f32.mrb[11].mxu0  ;;  %vm945_vm15 = vcmp.gt.f32.partialorder %v1263_v49, 0.0 }
 0x98b   :  { %v1122_v53 = vmin.f32 %v1270_v51, 0.0  ;;  %v946_v54 = vmin.f32 %v935_v52, 0.0  ;;  %v1110_v55 = vpop.f32.mrb[11].mxu1  ;;  %vm1120_vm0 = vcmp.gt.f32.partialorder %v1270_v51, 0.0  ;;  %vm944_vm2 = vcmp.gt.f32.partialorder %v935_v52, 0.0 }
 0x98c   :  { %v950_v56 = vmul.f32 1.442695, %v947_v50  ;;  %v1121_v57 = vmin.f32 %v1110_v55, 0.0  ;;  %vm1119_vm3 = vcmp.gt.f32.partialorder %v1110_v55, 0.0 }
 0x98d   :  { %v1125_v58 = vmul.f32 1.442695, %v1122_v53  ;;  %v948_v59 = vmul.f32 1.442695, %v946_v54 }
 0x98e   :  { %1332 = vpow2.f32 %v950_v56  ;;  %v1123_v60 = vmul.f32 1.442695, %v1121_v57 }
 0x98f   :  { %1334 = vpow2.f32 %v1125_v58 }
 0x990   :  { %1336 = vpow2.f32 %v948_v59 }
 0x991   :  { %1338 = vpow2.f32 %v1123_v60 }
 0x998   :  { %v1333_v61 = vpop.eup %1332 }
 0x999   :  { %v1335_v62 = vpop.eup %1334  ;;  %v1170_v63 = vadd.f32 -1.0, %v1333_v61 }
 0x99a   :  { %v1337_v0 = vpop.eup %1336  ;;  %v1174_v1 = vadd.f32 -1.0, %v1335_v62 }
 0x99b   :  { %v1339_v2 = vpop.eup %1338  ;;  %v955_v3 = vsel %vm945_vm15, %v1263_v49, %v1170_v63  ;;  %v1169_v4 = vadd.f32 -1.0, %v1337_v0 }
 0x99c   :  { %1132 = vst.msk [vmem:[%s1479_s5 + $0x8] sm:$0xff] %vm26_vm1, %v955_v3  ;;  %v1130_v5 = vsel %vm1120_vm0, %v1270_v51, %v1174_v1  ;;  %v1173_v6 = vadd.f32 -1.0, %v1339_v2 }
 0x99d   :  { %1134 = vst.msk [vmem:[%s1479_s5 + $0x18] sm:$0xff] %vm26_vm1, %v1130_v5  ;;  %v954_v7 = vsel %vm944_vm2, %v935_v52, %v1169_v4 }
 0x99e   :  { %1131 = vst.msk [vmem:[%s1479_s5] sm:$0xff] %vm26_vm1, %v954_v7  ;;  %v1129_v8 = vsel %vm1119_vm3, %v1110_v55, %v1173_v6 }
 0x99f   :  { %1133 = vst.msk [vmem:[%s1479_s5 + $0x10] sm:$0xff] %vm26_vm1, %v1129_v8 }

</bundles_post_ra>
